<compile_context>
chip_gen: v6e
topology: v6e:2x2x1
jax: 0.10.0
libtpu: 0.0.40
codegen_flags: <defaults>
</compile_context>

<pallas_src>
import functools

import jax
import jax.numpy as jnp
from jax.experimental import pallas as pl
from jax.experimental.pallas import tpu as pltpu


def mlp_kernel(xt_ref, w1_ref, b1_ref, w2_ref, b2_ref, o_ref):
    # Fused Linear(2E, H) on the concatenated input, batch on lanes:
    #   h^T = W1 @ x^T  with x^T: (2E, block_b), W1: (H, 2E)  -> (H, block_b)
    h = jnp.dot(w1_ref[...], xt_ref[...], preferred_element_type=jnp.float32)
    h = jnp.maximum(h + b1_ref[...], 0.0)          # bias + ReLU (VPU, f32)
    # Dropout: identity in eval mode.
    # Linear(H, 1): VPU multiply + cross-sublane reduce -> already a lane-dense
    # (1, block_b) row; the output store is a single unmasked row store.
    y = jnp.sum(h * w2_ref[...], axis=0, keepdims=True) + b2_ref[0]
    o_ref[...] = y.astype(o_ref.dtype)


@functools.partial(jax.jit, static_argnames=("block_b",))
def mlp_forward(user, mission, user_table, mission_table, w1, b1, w2, b2,
                *, block_b=512):
    """user, mission: [B] int32 ids.
    user_table: [num_users, E], mission_table: [num_missions, E]
    w1: [H, 2E]  (PyTorch Linear(2E,H).weight), b1: [H]
    w2: [1, H]   (PyTorch Linear(H,1).weight),  b2: [1]
    returns [B] scores (squeezed)."""
    B = user.shape[0]
    E = user_table.shape[1]
    H, in_dim = w1.shape                      # in_dim == 2E
    assert in_dim == 2 * E

    # Embedding gather + concat + transpose done by XLA (layout plumbing, fused
    # with the gather); kernel sees x^T with batch on the lane axis.
    u_emb = jnp.take(user_table, user, axis=0)          # [B, E]
    m_emb = jnp.take(mission_table, mission, axis=0)    # [B, E]
    x_t = jnp.concatenate([u_emb, m_emb], axis=1).T.astype(jnp.bfloat16)  # [2E, B]

    # Pad batch (lane axis) to a multiple of block_b; slice result back.
    n_blocks = pl.cdiv(B, block_b)
    Bp = n_blocks * block_b
    if Bp != B:
        x_t = jnp.pad(x_t, ((0, 0), (0, Bp - B)))

    w1_bf = w1.astype(jnp.bfloat16)                      # [H, 2E] resident
    b1_col = b1.reshape(H, 1).astype(jnp.float32)        # [H, 1]
    w2_col = w2.reshape(H, 1).astype(jnp.float32)        # [H, 1]
    b2_s = b2.reshape(1).astype(jnp.float32)             # (1,) scalar via SMEM

    # VMEM budget: computed need + headroom, capped well below v7x's 64 MiB.
    need = (2 * (in_dim * block_b * 2)    # x^T tile (bf16), double-buffered
            + 2 * (H * in_dim * 2)        # W1 (bf16), budgeted double-buffered
            + 2 * (2 * H * 4)             # b1 + w2 columns (f32)
            + 2 * (block_b * 4)           # (1, block_b) f32 output row
            + block_b * H * 4)            # f32 hidden intermediate
    vmem_limit = int(min(48 << 20, 2 * need + (4 << 20)))

    cost = pl.CostEstimate(
        flops=2 * Bp * in_dim * H + 2 * Bp * H,
        transcendentals=0,
        bytes_accessed=(Bp * in_dim * 2 + in_dim * H * 2 + 2 * H * 4 + 4
                        + Bp * 4),
    )

    out = pl.pallas_call(
        mlp_kernel,
        out_shape=jax.ShapeDtypeStruct((1, Bp), jnp.float32),
        grid_spec=pl.GridSpec(
            grid=(n_blocks,),
            in_specs=[
                pl.BlockSpec((in_dim, block_b), lambda i: (0, i)),   # x^T tile
                pl.BlockSpec((H, in_dim), lambda i: (0, 0)),         # W1 (resident)
                pl.BlockSpec((H, 1), lambda i: (0, 0)),              # b1 column
                pl.BlockSpec((H, 1), lambda i: (0, 0)),              # w2 column
                pl.BlockSpec(memory_space=pltpu.MemorySpace.SMEM),   # b2 scalar
            ],
            out_specs=pl.BlockSpec((1, block_b), lambda i: (0, i)),
        ),
        compiler_params=pltpu.CompilerParams(
            dimension_semantics=("parallel",),
            vmem_limit_bytes=vmem_limit,
        ),
        cost_estimate=cost,
    )(x_t, w1_bf, b1_col, w2_col, b2_s)

    return out[0, :B]   # drop padding + squeeze


def reference_forward(user, mission, user_table, mission_table, w1, b1, w2, b2):
    u_emb = user_table[user]
    m_emb = mission_table[mission]
    x = jnp.concatenate([u_emb, m_emb], axis=1)
    h = jnp.maximum(x @ w1.T + b1, 0.0)
    return (h @ w2.T + b2)[:, 0]


if __name__ == "__main__":
    # Small shapes consistent with MLP(num_users, num_missions, emb, hidden, dropout).
    num_users, num_missions = 64, 48
    embedding_dim, hidden_dim = 32, 64
    B = 900            # not a multiple of block_b -> exercises the padded last tile
    block_b = 512      # grid = 2 (even -> both v7x TensorCores used)

    key = jax.random.PRNGKey(0)
    ks = jax.random.split(key, 8)

    user = jax.random.randint(ks[0], (B,), 0, num_users, dtype=jnp.int32)
    mission = jax.random.randint(ks[1], (B,), 0, num_missions, dtype=jnp.int32)

    def xavier(k, shape):
        bound = (6.0 / (shape[0] + shape[1])) ** 0.5
        return jax.random.uniform(k, shape, jnp.float32, -bound, bound)

    user_table = xavier(ks[2], (num_users, embedding_dim))
    mission_table = xavier(ks[3], (num_missions, embedding_dim))

    fan_in1 = 2 * embedding_dim
    bound1 = 1.0 / (fan_in1 ** 0.5)
    w1 = jax.random.uniform(ks[4], (hidden_dim, fan_in1), jnp.float32, -bound1, bound1)
    b1 = jax.random.uniform(ks[5], (hidden_dim,), jnp.float32, -bound1, bound1)
    bound2 = 1.0 / (hidden_dim ** 0.5)
    w2 = jax.random.uniform(ks[6], (1, hidden_dim), jnp.float32, -bound2, bound2)
    b2 = jax.random.uniform(ks[7], (1,), jnp.float32, -bound2, bound2)

    out = mlp_forward(user, mission, user_table, mission_table,
                      w1, b1, w2, b2, block_b=block_b)
    out = jax.block_until_ready(out)

    ref = reference_forward(user, mission, user_table, mission_table, w1, b1, w2, b2)
    assert out.shape == (B,)
    # bf16 inputs on the MXU path -> loosened tolerance (f32 accumulation kept).
    assert jnp.allclose(out, ref, atol=2e-2, rtol=2e-2), "mismatch vs reference"

    print("KERNEL_OK")
</pallas_src>

<mosaic_0001>
module attributes {stable_mosaic.version = 11 : i64} {
  func.func @mlp_kernel(%arg0: i32, %arg1: memref<64x512xbf16, #tpu.memory_space<vmem>>, %arg2: memref<64x64xbf16, #tpu.memory_space<vmem>>, %arg3: memref<64x1xf32, #tpu.memory_space<vmem>>, %arg4: memref<64x1xf32, #tpu.memory_space<vmem>>, %arg5: memref<1xf32, #tpu.memory_space<smem>>, %arg6: memref<1x512xf32, #tpu.memory_space<vmem>>) attributes {dimension_semantics = [#tpu.dimension_semantics<parallel>], iteration_bounds = array<i64: 2>, scalar_prefetch = 0 : i64, scratch_operands = 0 : i64, tpu.core_type = #tpu.core_type<tc>, window_params = [{transform_indices = @transform_0, window_bounds = array<i64: 64, 512>}, {pipeline_mode = #tpu.pipeline_mode<synchronous>, transform_indices = @transform_1, window_bounds = array<i64: 64, 64>}, {pipeline_mode = #tpu.pipeline_mode<synchronous>, transform_indices = @transform_2, window_bounds = array<i64: 64, 1>}, {pipeline_mode = #tpu.pipeline_mode<synchronous>, transform_indices = @transform_3, window_bounds = array<i64: 64, 1>}, {transform_indices = @transform_4, window_bounds = array<i64: 1>}, {transform_indices = @transform_5, window_bounds = array<i64: 1, 512>}]} {
    %c0 = arith.constant 0 : index
    %c0_0 = arith.constant 0 : index
    %0 = vector.load %arg2[%c0, %c0_0] : memref<64x64xbf16, #tpu.memory_space<vmem>>, vector<64x64xbf16>
    %c0_1 = arith.constant 0 : index
    %c0_2 = arith.constant 0 : index
    %1 = vector.load %arg1[%c0_1, %c0_2] : memref<64x512xbf16, #tpu.memory_space<vmem>>, vector<64x512xbf16>
    %cst = arith.constant dense<0.000000e+00> : vector<64x512xf32>
    %2 = tpu.matmul %0, %1, %cst {dimension_numbers = #tpu.dot_dimension_numbers<[1], [0], [0], [1], [0, 0, 1, 1], [], []>} : vector<64x64xbf16>, vector<64x512xbf16>, vector<64x512xf32> -> vector<64x512xf32>
    %c0_3 = arith.constant 0 : index
    %c0_4 = arith.constant 0 : index
    %3 = vector.load %arg3[%c0_3, %c0_4] : memref<64x1xf32, #tpu.memory_space<vmem>>, vector<64x1xf32>
    %4 = vector.broadcast %3 : vector<64x1xf32> to vector<64x512xf32>
    %5 = arith.addf %2, %4 : vector<64x512xf32>
    %cst_5 = arith.constant 0.000000e+00 : f32
    %6 = vector.broadcast %cst_5 : f32 to vector<64x512xf32>
    %7 = arith.maximumf %5, %6 : vector<64x512xf32>
    %c0_6 = arith.constant 0 : index
    %c0_7 = arith.constant 0 : index
    %8 = vector.load %arg4[%c0_6, %c0_7] : memref<64x1xf32, #tpu.memory_space<vmem>>, vector<64x1xf32>
    %9 = vector.broadcast %8 : vector<64x1xf32> to vector<64x512xf32>
    %10 = arith.mulf %7, %9 : vector<64x512xf32>
    %cst_8 = arith.constant dense<0.000000e+00> : vector<512xf32>
    %11 = vector.multi_reduction <add>, %10, %cst_8 [0] : vector<64x512xf32> to vector<512xf32>
    %12 = vector.shape_cast %11 : vector<512xf32> to vector<1x512xf32>
    %c0_9 = arith.constant 0 : index
    %13 = memref.load %arg5[%c0_9] : memref<1xf32, #tpu.memory_space<smem>>
    %14 = vector.broadcast %13 : f32 to vector<1x512xf32>
    %15 = arith.addf %12, %14 : vector<1x512xf32>
    %c0_10 = arith.constant 0 : index
    %c0_11 = arith.constant 0 : index
    %16 = vector.load %arg6[%c0_10, %c0_11] : memref<1x512xf32, #tpu.memory_space<vmem>>, vector<1x512xf32>
    tpu.vector_store %arg6[%c0_10, %c0_11], %15 {strides = array<i32>} : memref<1x512xf32, #tpu.memory_space<vmem>>, vector<1x512xf32>,
    return
  }
  func.func @transform_0(%arg0: i32) -> (i32, i32) {
    %c0_i32 = arith.constant 0 : i32
    %c0_i32_0 = arith.constant 0 : i32
    return %c0_i32, %arg0 : i32, i32
  }
  func.func @transform_1(%arg0: i32) -> (i32, i32) {
    %c0_i32 = arith.constant 0 : i32
    %c0_i32_0 = arith.constant 0 : i32
    %c0_i32_1 = arith.constant 0 : i32
    return %c0_i32, %c0_i32_0 : i32, i32
  }
  func.func @transform_2(%arg0: i32) -> (i32, i32) {
    %c0_i32 = arith.constant 0 : i32
    %c0_i32_0 = arith.constant 0 : i32
    %c0_i32_1 = arith.constant 0 : i32
    return %c0_i32, %c0_i32_0 : i32, i32
  }
  func.func @transform_3(%arg0: i32) -> (i32, i32) {
    %c0_i32 = arith.constant 0 : i32
    %c0_i32_0 = arith.constant 0 : i32
    %c0_i32_1 = arith.constant 0 : i32
    return %c0_i32, %c0_i32_0 : i32, i32
  }
  func.func @transform_4(%arg0: i32) -> i32 {
    %c0_i32 = arith.constant 0 : i32
    %c0_i32_0 = arith.constant 0 : i32
    return %c0_i32 : i32
  }
  func.func @transform_5(%arg0: i32) -> (i32, i32) {
    %c0_i32 = arith.constant 0 : i32
    %c0_i32_0 = arith.constant 0 : i32
    return %c0_i32, %arg0 : i32, i32
  }
}

</mosaic_0001>

<bundles_post_ra>
// kernel: mlp_forward.1
= control target key start
LH: loop header
LB: loop body
LE: loop exit
PB: predicated region body
PF: predicated region fallthrough
CT: control target
= control target key end

     0   :  { %s1322_s0 = inlined_call_operand.vmem [shape: bf16[64,1024], index: 0, kind: input, shape index: {}]   ;;  %s1323_s1 = inlined_call_operand.vmem [shape: bf16[64,64], index: 1, kind: input, shape index: {}]   ;;  %s1324_s2 = inlined_call_operand.vmem [shape: f32[64,1], index: 2, kind: input, shape index: {}]   ;;  %s1325_s3 = inlined_call_operand.vmem [shape: f32[64,1], index: 3, kind: input, shape index: {}]   ;;  %s1326_s4 = inlined_call_operand.<no memory space> [shape: f32[1], index: 4, kind: input, shape index: {}]   ;;  %s1327_s5 = inlined_call_operand.hbm [shape: f32[1,1024], index: 5, kind: output, shape index: {}]  }
   0x1   :  { %10 = sst [smem:[#allocation2]] %s1326_s4 }
   0x2   :  { %11 = vsyncpa [#allocation5], 0 }
   0x3   :  { %13 = vsyncpa [#allocation5 + $0x1], 0  ;;  %s1105_s20 = smov 0   ;;  %s1107_s21 = smov 0  }
   0x4   :  { %s1109_s22 = smov 0   ;;  %s1111_s23 = smov 0  }
   0x5 LB: > { %s891_s4 = sadd.s32 4294967295, %s1067_s23   ;;  %s892_s24 = sadd.s32 4294967294, %s1067_s23   ;;  %s1067_s23 = sphi %s1111_s23, %s1335_s23   ;;  %s1063_s22 = sphi %s1109_s22, %s1334_s22   ;;  %s1059_s21 = sphi %s1107_s21, %s1333_s21   ;;  %s1055_s20 = sphi %s1105_s20, %s1332_s20  }
   0x6   : > { %s1128_s25 = sadd.s32 1, %s1067_s23   ;;  %s26_s26 = sadd.s32 1, %s1063_s22 }
   0x7   : > { %s23_s27 = ssub.s32 %s1067_s23, %s1128_s25  ;;  %p33_p0 = scmp.ne.s32.totalorder %s1063_s22, %s1059_s21 }
   0x8   : > { %p24_p1 = scmp.eq.s32.totalorder %s23_s27, 0  ;;  %p34_p2 = scmp.eq.s32.totalorder %s1067_s23, 0 }
   0x9   : > { %p147_p3 = scmp.eq.s32.totalorder %s891_s4, 1  ;;  %p152_p4 = scmp.ne.s32.totalorder %s1059_s21, %s1055_s20 }
   0xa   : > { %s1141_s28 = scalar_select %p24_p1, %s1063_s22, %s26_s26  }
   0xb   : > { %p35_p5 = por %p34_p2, %p33_p0  ;;  %p1143_p6 = por %p147_p3, %p33_p0 }
   0xc   : > { %p153_p7 = scmp.eq.s32.totalorder %s892_s24, 1  ;;  %p1328_p9 = scmp.ge.s32.totalorder %s1067_s23, 2 }
   0xe   : > { %p1147_p8 = por %p153_p7, %p152_p4  ;;  %181 = sbr.rel (%p1328_p9) target bundleno = 31 (0x1f), region = 32 }
  0x13   : > { %184 = sbr.rel (!%p35_p5) target bundleno = 31 (0x1f), region = 36  ;;  %s186_s6 = sand.u32 (%p35_p5), 1, %s1063_s22  }
  0x14   : > { %s934_s7 = sshll.u32 (%p35_p5), %s1067_s23, 4  ;;  %s895_s8 = sshll.u32 (%p35_p5), %s186_s6, 7 }
  0x15   : > { %s1159_s11 = scalar_lea.vmem (%p35_p5), %s1322_s0, %s934_s7  ;;  %s188_s12 = scalar_lea.vmem (%p35_p5), [#allocation3], %s895_s8 }
  0x16   : > { %v204_v0 = vld [vmem:[%s1159_s11] sm:$0xff] (%p35_p5)  ;;  %v206_v1 = vld [vmem:[%s1159_s11 + $0x8] sm:$0xff] (%p35_p5) }
  0x17   : > { %v208_v2 = vld [vmem:[%s1159_s11 + $0x20] sm:$0xff] (%p35_p5)  ;;  %205 = vst [vmem:[%s188_s12] sm:$0xff] (%p35_p5), %v204_v0  ;;  %207 = vst [vmem:[%s188_s12 + $0x8] sm:$0xff] (%p35_p5), %v206_v1  ;;  %v210_v3 = vld [vmem:[%s1159_s11 + $0x28] sm:$0xff] (%p35_p5) }
  0x18   : > { %209 = vst [vmem:[%s188_s12 + $0x10] sm:$0xff] %v208_v2  ;;  %v212_v4 = vld [vmem:[%s1159_s11 + $0x40] sm:$0xff]  ;;  %v214_v5 = vld [vmem:[%s1159_s11 + $0x48] sm:$0xff]  ;;  %211 = vst [vmem:[%s188_s12 + $0x18] sm:$0xff] %v210_v3 }
  0x19   : > { %213 = vst [vmem:[%s188_s12 + $0x20] sm:$0xff] %v212_v4  ;;  %215 = vst [vmem:[%s188_s12 + $0x28] sm:$0xff] %v214_v5  ;;  %v216_v6 = vld [vmem:[%s1159_s11 + $0x60] sm:$0xff]  ;;  %v218_v7 = vld [vmem:[%s1159_s11 + $0x68] sm:$0xff] }
  0x1a   : > { %v220_v8 = vld [vmem:[%s1159_s11 + $0x80] sm:$0xff]  ;;  %217 = vst [vmem:[%s188_s12 + $0x30] sm:$0xff] %v216_v6  ;;  %219 = vst [vmem:[%s188_s12 + $0x38] sm:$0xff] %v218_v7  ;;  %v222_v9 = vld [vmem:[%s1159_s11 + $0x88] sm:$0xff] }
  0x1b   : > { %221 = vst [vmem:[%s188_s12 + $0x40] sm:$0xff] %v220_v8  ;;  %v224_v10 = vld [vmem:[%s1159_s11 + $0xa0] sm:$0xff]  ;;  %v226_v11 = vld [vmem:[%s1159_s11 + $0xa8] sm:$0xff]  ;;  %223 = vst [vmem:[%s188_s12 + $0x48] sm:$0xff] %v222_v9 }
  0x1c   : > { %225 = vst [vmem:[%s188_s12 + $0x50] sm:$0xff] %v224_v10  ;;  %227 = vst [vmem:[%s188_s12 + $0x58] sm:$0xff] %v226_v11  ;;  %v228_v12 = vld [vmem:[%s1159_s11 + $0xc0] sm:$0xff]  ;;  %v230_v13 = vld [vmem:[%s1159_s11 + $0xc8] sm:$0xff] }
  0x1d   : > { %v232_v14 = vld [vmem:[%s1159_s11 + $0xe0] sm:$0xff]  ;;  %229 = vst [vmem:[%s188_s12 + $0x60] sm:$0xff] %v228_v12  ;;  %231 = vst [vmem:[%s188_s12 + $0x68] sm:$0xff] %v230_v13  ;;  %v234_v15 = vld [vmem:[%s1159_s11 + $0xe8] sm:$0xff] }
  0x1e   : > { %233 = vst [vmem:[%s188_s12 + $0x70] sm:$0xff] %v232_v14  ;;  %235 = vst [vmem:[%s188_s12 + $0x78] sm:$0xff] %v234_v15 }
  0x1f PF: > { %p898_p10 = scmp.ge.s32.totalorder %s1067_s23, 1  ;;  %p240_p11 = scmp.lt.s32.totalorder %s1067_s23, 3 }
  0x21   : > { %p241_p12 = pnand %p898_p10, %p240_p11 }
  0x22   : > { %s1180_s13 = sand.u32 (!%p241_p12), 1, %s1059_s21   ;;  %s772_s7 = sld [smem:[#allocation2]] (!%p241_p12) }
  0x23   : > { %244 = sbr.rel (%p241_p12) target bundleno = 325 (0x145), region = 59  ;;  %s899_s14 = sshll.u32 (!%p241_p12), %s1180_s13, 7 }
  0x24   : > { %s249_s15 = scalar_lea.vmem (!%p241_p12), [#allocation3], %s899_s14  ;;  %s900_s8 = sshll.u32 (!%p241_p12), %s1180_s13, 2 }
  0x25   : > { %s935_s9 = sshll.u32 (!%p241_p12), %s891_s4, 6  ;;  %s273_s10 = scalar_lea.vmem (!%p241_p12), [#allocation4], %s900_s8 }
  0x26   : > { %s827_s11 = sshll.u32 (!%p241_p12), %s273_s10, 4  ;;  %s813_s16 = scalar_lea.sflag (!%p241_p12), [#allocation5], %s1180_s13  ;;  %s828_s11 = int_to_ptr.vmem [resolvable:$true] %s827_s11 }
  0x27   : > { %s1007_s17 = scalar_lea.vmem (!%p241_p12), %s828_s11, 64  ;;  %s1071_s18 = smov (!%p241_p12), [#allocation4]  }
  0x28   : > { %v1069_v16 = vmov 0   ;;  %v979_v17 = vld [vmem:[%s249_s15 + $0x64] ss:$16 sps:$4 sm:$0xff]   ;;  %v981_v18 = vld [vmem:[%s249_s15 + $0x6c] ss:$16 sps:$4 sm:$0xff]   ;;  %vm449_vm0 = vcmask 523264   ;;  %p1008_p13 = scmp.ne.s32.totalorder %s828_s11, %s1007_s17 }
  0x29   : > { %494 = vmatprep.mubr.bf16.mxu0 %v1069_v16  ;;  %567 = vmatprep.mubr.bf16.mxu1 %v1069_v16  ;;  %v983_v19 = vld [vmem:[%s249_s15 + $0x60] ss:$16 sps:$4 sm:$0xff]   ;;  %v984_v20 = vld [vmem:[%s249_s15 + $0x68] ss:$16 sps:$4 sm:$0xff]   ;;  %v985_v21 = vld [vmem:[%s249_s15 + $0x44] ss:$16 sps:$4 sm:$0xff]  }
  0x2a   : > { %977 = vset.pattern.permute.xlu0 %v1069_v16  ;;  %978 = vset.pattern.permute.xlu1 %v1069_v16  ;;  %v987_v22 = vld [vmem:[%s249_s15 + $0x4c] ss:$16 sps:$4 sm:$0xff]   ;;  %v989_v23 = vld [vmem:[%s249_s15 + $0x40] ss:$16 sps:$4 sm:$0xff]   ;;  %v990_v24 = vld [vmem:[%s249_s15 + $0x48] ss:$16 sps:$4 sm:$0xff]   ;;  %p1009_p0 = pnand %p1008_p13, %p1143_p6 }
  0x2b   : > { %470 = vmatprep.subr.bf16.mxu0 %v979_v17  ;;  %543 = vmatprep.subr.bf16.mxu1 %v981_v18  ;;  %v991_v25 = vld [vmem:[%s249_s15 + $0x24] ss:$16 sps:$4 sm:$0xff]   ;;  %v993_v26 = vld [vmem:[%s249_s15 + $0x2c] ss:$16 sps:$4 sm:$0xff]   ;;  %v995_v27 = vld [vmem:[%s249_s15 + $0x20] ss:$16 sps:$4 sm:$0xff]  }
  0x2c   : > { %471 = vmatpush1.bf16.msra.mxu0 %v983_v19  ;;  %544 = vmatpush1.bf16.msra.mxu1 %v984_v20  ;;  %v996_v28 = vld [vmem:[%s249_s15 + $0x28] ss:$16 sps:$4 sm:$0xff]   ;;  %v997_v29 = vld [vmem:[%s249_s15 + $0x4] ss:$16 sps:$4 sm:$0xff]   ;;  %v999_v30 = vld [vmem:[%s249_s15 + $0xc] ss:$16 sps:$4 sm:$0xff]   ;;  %p1010_p1 = pneg %p1009_p0 }
  0x2d   : > { %472 = vmatprep.subr.bf16.mxu0 %v985_v21  ;;  %545 = vmatprep.subr.bf16.mxu1 %v987_v22  ;;  %v1001_v31 = vld [vmem:[%s249_s15] ss:$16 sps:$4 sm:$0xff]   ;;  %v1002_v32 = vld [vmem:[%s249_s15 + $0x8] ss:$16 sps:$4 sm:$0xff]   ;;  %s825_s15 = scalar_lea.hbm %s1327_s5, %s935_s9  ;;  %s1011_s19 = sshll.u32 %s1071_s18, 4  ;;  %s1012_s19 = int_to_ptr.vmem [resolvable:$false] %s1011_s19 }
  0x2e   : > { %v301_v33 = vld [vmem:[%s1324_s2] sm:$0xff]  ;;  %v303_v34 = vld [vmem:[%s1324_s2 + $0x10] sm:$0xff]  ;;  %v302_v36 = vld [vmem:[%s1324_s2 + $0x8] sm:$0xff]  ;;  %s1013_s4 = scalar_lea.vmem %s1012_s19, 128  ;;  %p1014_p2 = scmp.lt.s32.totalorder %s828_s11, %s1012_s19 }
  0x2f   : > { %311 = vperm.xlu0 %977, %v301_v33   ;;  %321 = vperm.xlu1 %978, %v303_v34   ;;  %v1003_v35 = vld [vmem:[%s1323_s1] sm:$0xff]   ;;  %v304_v37 = vld [vmem:[%s1324_s2 + $0x18] sm:$0xff]  ;;  %v641_v39 = vld [vmem:[%s1325_s3 + $0x8] sm:$0xff]  ;;  %p1015_p3 = scmp.lt.s32.totalorder %s1013_s4, %s1007_s17 }
  0x30   : > { %473 = vmatpush1.bf16.msra.mxu0 %v989_v23  ;;  %546 = vmatpush1.bf16.msra.mxu1 %v990_v24  ;;  %v640_v38 = vld [vmem:[%s1325_s3] sm:$0xff]  ;;  %v1004_v40 = vld [vmem:[%s1323_s1 + $0x8] sm:$0xff]   ;;  %v642_v42 = vld [vmem:[%s1325_s3 + $0x10] sm:$0xff] }
  0x31   : > { %474 = vmatprep.subr.bf16.mxu0 %v991_v25  ;;  %547 = vmatprep.subr.bf16.mxu1 %v993_v26  ;;  %v305_v41 = vld [vmem:[%s1324_s2 + $0x20] sm:$0xff]  ;;  %v306_v43 = vld [vmem:[%s1324_s2 + $0x28] sm:$0xff]  ;;  %v643_v44 = vld [vmem:[%s1325_s3 + $0x18] sm:$0xff]  ;;  %p1016_p4 = por %p1015_p3, %p1014_p2 }
  0x32   : > { %v1005_v45 = vld [vmem:[%s1323_s1 + $0x10] sm:$0xff]   ;;  %v644_v47 = vld [vmem:[%s1325_s3 + $0x20] sm:$0xff]  ;;  %v308_v48 = vld [vmem:[%s1324_s2 + $0x38] sm:$0xff] }
  0x33   : > { %316 = vperm.xlu0 %977, %v302_v36   ;;  %326 = vperm.xlu1 %978, %v304_v37   ;;  %v307_v46 = vld [vmem:[%s1324_s2 + $0x30] sm:$0xff]  ;;  %v645_v49 = vld [vmem:[%s1325_s3 + $0x28] sm:$0xff]  ;;  %v1006_v50 = vld [vmem:[%s1323_s1 + $0x18] sm:$0xff]   ;;  %p1017_p5 = pnand %p1016_p4, %p1010_p1 }
  0x34   : > { %475 = vmatpush1.bf16.msra.mxu0 %v995_v27  ;;  %548 = vmatpush1.bf16.msra.mxu1 %v996_v28  ;;  %v646_v51 = vld [vmem:[%s1325_s3 + $0x30] sm:$0xff]  ;;  %v647_v52 = vld [vmem:[%s1325_s3 + $0x38] sm:$0xff] }
  0x35   : > { %476 = vmatprep.subr.bf16.mxu0 %v997_v29  ;;  %549 = vmatprep.subr.bf16.mxu1 %v999_v30 }
  0x37   : > { %650 = vperm.xlu0 %977, %v640_v38   ;;  %655 = vperm.xlu1 %978, %v641_v39  }
  0x38   : > { %477 = vmatpush1.bf16.msra.mxu0 %v1001_v31  ;;  %550 = vmatpush1.bf16.msra.mxu1 %v1002_v32 }
  0x3b   : > { %921 = vmatmul.mubr.msk.bf16.vlgmr.msra.gmra.mxu0 %vm449_vm0, %v1003_v35  ;;  %925 = vmatmul.mubr.msk.bf16.vlgmr.msra.gmra.mxu1 %vm449_vm0, %v1003_v35 }
  0x3c   : > { %504 = vmatprep.mubr.bf16.mxu0 %v1069_v16  ;;  %577 = vmatprep.mubr.bf16.mxu1 %v1069_v16 }
  0x3d   : > { %331 = vperm.xlu0 %977, %v305_v41   ;;  %660 = vperm.xlu1 %978, %v642_v42  }
  0x41   : > { %336 = vperm.xlu0 %977, %v306_v43   ;;  %665 = vperm.xlu1 %978, %v643_v44  }
  0x43   : > { %922 = vmatmul.mubr.msk.bf16.gmra.mxu0 %vm449_vm0, %v1004_v40  ;;  %926 = vmatmul.mubr.msk.bf16.gmra.mxu1 %vm449_vm0, %v1004_v40 }
  0x44   : > { %514 = vmatprep.mubr.bf16.mxu0 %v1069_v16  ;;  %587 = vmatprep.mubr.bf16.mxu1 %v1069_v16 }
  0x45   : > { %341 = vperm.xlu0 %977, %v307_v46   ;;  %670 = vperm.xlu1 %978, %v644_v47  }
  0x49   : > { %346 = vperm.xlu0 %977, %v308_v48   ;;  %675 = vperm.xlu1 %978, %v645_v49  }
  0x4b   : > { %923 = vmatmul.mubr.msk.bf16.gmra.mxu0 %vm449_vm0, %v1005_v45  ;;  %927 = vmatmul.mubr.msk.bf16.gmra.mxu1 %vm449_vm0, %v1005_v45 }
  0x4c   : > { %524 = vmatprep.mubr.bf16.mxu0 %v1069_v16  ;;  %597 = vmatprep.mubr.bf16.mxu1 %v1069_v16 }
  0x4d   : > { %680 = vperm.xlu0 %977, %v646_v51   ;;  %685 = vperm.xlu1 %978, %v647_v52  }
  0x53   : > { %924 = vmatmul.mubr.msk.bf16.gmra.mxu0 %vm449_vm0, %v1006_v50  ;;  %928 = vmatmul.mubr.msk.bf16.gmra.mxu1 %vm449_vm0, %v1006_v50 }
  0xaa   : > { %v312_v53 = vpop.permute.xlu0 %311  ;;  %v322_v54 = vpop.permute.xlu1 %321 }
  0xae   : > { %v317_v55 = vpop.permute.xlu0 %316  ;;  %v1261_v56 = vpop.permute.xlu1 %326 }
  0xb2   : > { %v651_v57 = vpop.permute.xlu0 %650  ;;  %v656_v60 = vpop.permute.xlu1 %655 }
  0xb8   : > { %v1263_v1 = vpop.permute.xlu0 %331  ;;  %v661_v12 = vpop.permute.xlu1 %660 }
  0xbc   : > { %v1265_v21 = vpop.permute.xlu0 %336  ;;  %v666_v40 = vpop.permute.xlu1 %665 }
  0xc0   : > { %v1269_v51 = vpop.permute.xlu0 %341 }
  0xfb   : > { %v496_v58 = vpop.f32.mrf.mxu0  ;;  %v569_v59 = vpop.f32.mrf.mxu1 }
  0xfc   : > { %v497_v61 = vadd.f32 %v496_v58, %v312_v53  ;;  %v570_v62 = vadd.f32 %v569_v59, %v312_v53 }
  0xfd   : > { %v498_v63 = vpop.f32.mrf.mxu0  ;;  %v571_v0 = vpop.f32.mrf.mxu1 }
  0xfe   : > { %v499_v2 = vadd.f32 %v498_v63, %v312_v53  ;;  %v572_v3 = vadd.f32 %v571_v0, %v312_v53  ;;  %v608_v6 = vmax.f32 %v497_v61, 0.0  ;;  %v610_v7 = vmax.f32 %v570_v62, 0.0 }
  0xff   : > { %v500_v4 = vpop.f32.mrf.mxu0  ;;  %v573_v5 = vpop.f32.mrf.mxu1 }
 0x100   : > { %v501_v8 = vadd.f32 %v500_v4, %v317_v55  ;;  %v574_v9 = vadd.f32 %v573_v5, %v317_v55  ;;  %v609_v15 = vmax.f32 %v499_v2, 0.0  ;;  %v611_v16 = vmax.f32 %v572_v3, 0.0 }
 0x101   : > { %v502_v10 = vpop.f32.mrf.mxu0  ;;  %v575_v11 = vpop.f32.mrf.mxu1  ;;  %v688_v26 = vmul.f32 %v651_v57, %v608_v6  ;;  %v690_v27 = vmul.f32 %v651_v57, %v610_v7 }
 0x102   : > { %v503_v13 = vadd.f32 %v502_v10, %v317_v55  ;;  %v576_v14 = vadd.f32 %v575_v11, %v317_v55  ;;  %v612_v17 = vmax.f32 %v501_v8, 0.0  ;;  %v614_v18 = vmax.f32 %v574_v9, 0.0  ;;  %v671_v10 = vpop.permute.xlu1 %670 }
 0x103   : > { %v506_v19 = vpop.f32.mrf.mxu0  ;;  %v579_v20 = vpop.f32.mrf.mxu1  ;;  %v689_v34 = vmul.f32 %v651_v57, %v609_v15  ;;  %v691_v35 = vmul.f32 %v651_v57, %v611_v16 }
 0x104   : > { %v613_v22 = vmax.f32 %v503_v13, 0.0  ;;  %v615_v23 = vmax.f32 %v576_v14, 0.0  ;;  %v507_v24 = vadd.f32 %v506_v19, %v322_v54  ;;  %v580_v25 = vadd.f32 %v579_v20, %v322_v54  ;;  %v347_v20 = vpop.permute.xlu0 %346 }
 0x105   : > { %v508_v28 = vpop.f32.mrf.mxu0  ;;  %v581_v29 = vpop.f32.mrf.mxu1  ;;  %v692_v30 = vmul.f32 %v656_v60, %v612_v17  ;;  %v694_v31 = vmul.f32 %v656_v60, %v614_v18 }
 0x106   : > { %v616_v32 = vmax.f32 %v507_v24, 0.0  ;;  %v618_v33 = vmax.f32 %v580_v25, 0.0  ;;  %v509_v36 = vadd.f32 %v508_v28, %v322_v54  ;;  %v582_v37 = vadd.f32 %v581_v29, %v322_v54 }
 0x107   : > { %v510_v38 = vpop.f32.mrf.mxu0  ;;  %v583_v39 = vpop.f32.mrf.mxu1  ;;  %v693_v41 = vmul.f32 %v656_v60, %v613_v22  ;;  %v695_v42 = vmul.f32 %v656_v60, %v615_v23  ;;  %v720_v52 = vadd.f32 %v692_v30, %v688_v26  ;;  %v746_v53 = vadd.f32 %v694_v31, %v690_v27 }
 0x108   : > { %v696_v43 = vmul.f32 %v661_v12, %v616_v32  ;;  %v698_v44 = vmul.f32 %v661_v12, %v618_v33  ;;  %v617_v45 = vmax.f32 %v509_v36, 0.0  ;;  %v619_v46 = vmax.f32 %v582_v37, 0.0 }
 0x109   : > { %v511_v47 = vadd.f32 %v510_v38, %v1261_v56  ;;  %v584_v48 = vadd.f32 %v583_v39, %v1261_v56  ;;  %v512_v49 = vpop.f32.mrf.mxu0  ;;  %v585_v50 = vpop.f32.mrf.mxu1  ;;  %v733_v4 = vadd.f32 %v693_v41, %v689_v34  ;;  %v759_v5 = vadd.f32 %v695_v42, %v691_v35 }
 0x10a   : > { %v513_v54 = vadd.f32 %v512_v49, %v1261_v56  ;;  %v586_v55 = vadd.f32 %v585_v50, %v1261_v56  ;;  %v697_v57 = vmul.f32 %v661_v12, %v617_v45  ;;  %v699_v58 = vmul.f32 %v661_v12, %v619_v46  ;;  %v676_v41 = vpop.permute.xlu1 %675 }
 0x10b   : > { %v620_v59 = vmax.f32 %v511_v47, 0.0  ;;  %v622_v60 = vmax.f32 %v584_v48, 0.0  ;;  %v516_v61 = vpop.f32.mrf.mxu0  ;;  %v589_v62 = vpop.f32.mrf.mxu1  ;;  %v721_v6 = vadd.f32 %v720_v52, %v696_v43  ;;  %v747_v7 = vadd.f32 %v746_v53, %v698_v44 }
 0x10c   : > { %v621_v63 = vmax.f32 %v513_v54, 0.0  ;;  %v623_v0 = vmax.f32 %v586_v55, 0.0  ;;  %v517_v2 = vadd.f32 %v516_v61, %v1263_v1  ;;  %v590_v3 = vadd.f32 %v589_v62, %v1263_v1 }
 0x10d   : > { %v518_v8 = vpop.f32.mrf.mxu0  ;;  %v591_v9 = vpop.f32.mrf.mxu1  ;;  %v700_v56 = vmul.f32 %v666_v40, %v620_v59  ;;  %v702_v11 = vmul.f32 %v666_v40, %v622_v60  ;;  %v734_v14 = vadd.f32 %v733_v4, %v697_v57  ;;  %v760_v15 = vadd.f32 %v759_v5, %v699_v58 }
 0x10e   : > { %v624_v12 = vmax.f32 %v517_v2, 0.0  ;;  %v626_v13 = vmax.f32 %v590_v3, 0.0  ;;  %v519_v16 = vadd.f32 %v518_v8, %v1263_v1  ;;  %v592_v17 = vadd.f32 %v591_v9, %v1263_v1 }
 0x10f   : > { %v520_v18 = vpop.f32.mrf.mxu0  ;;  %v593_v19 = vpop.f32.mrf.mxu1  ;;  %v701_v22 = vmul.f32 %v666_v40, %v621_v63  ;;  %v703_v23 = vmul.f32 %v666_v40, %v623_v0  ;;  %v722_v32 = vadd.f32 %v721_v6, %v700_v56  ;;  %v748_v33 = vadd.f32 %v747_v7, %v702_v11 }
 0x110   : > { %v704_v24 = vmul.f32 %v671_v10, %v624_v12  ;;  %v706_v25 = vmul.f32 %v671_v10, %v626_v13  ;;  %v625_v26 = vmax.f32 %v519_v16, 0.0  ;;  %v627_v27 = vmax.f32 %v592_v17, 0.0  ;;  %v686_v17 = vpop.permute.xlu1 %685 }
 0x111   : > { %v521_v28 = vadd.f32 %v520_v18, %v1265_v21  ;;  %v594_v29 = vadd.f32 %v593_v19, %v1265_v21  ;;  %v522_v30 = vpop.f32.mrf.mxu0  ;;  %v595_v31 = vpop.f32.mrf.mxu1  ;;  %v735_v46 = vadd.f32 %v734_v14, %v701_v22  ;;  %v761_v47 = vadd.f32 %v760_v15, %v703_v23 }
 0x112   : > { %v523_v34 = vadd.f32 %v522_v30, %v1265_v21  ;;  %v596_v1 = vadd.f32 %v595_v31, %v1265_v21  ;;  %v705_v35 = vmul.f32 %v671_v10, %v625_v26  ;;  %v707_v36 = vmul.f32 %v671_v10, %v627_v27  ;;  %v681_v21 = vpop.permute.xlu0 %680 }
 0x113   : > { %v628_v37 = vmax.f32 %v521_v28, 0.0  ;;  %v630_v38 = vmax.f32 %v594_v29, 0.0  ;;  %v526_v39 = vpop.f32.mrf.mxu0  ;;  %v599_v40 = vpop.f32.mrf.mxu1  ;;  %v723_v48 = vadd.f32 %v722_v32, %v704_v24  ;;  %v749_v49 = vadd.f32 %v748_v33, %v706_v25 }
 0x114   : > { %v629_v42 = vmax.f32 %v523_v34, 0.0  ;;  %v631_v43 = vmax.f32 %v596_v1, 0.0  ;;  %v527_v44 = vadd.f32 %v526_v39, %v1269_v51  ;;  %v600_v45 = vadd.f32 %v599_v40, %v1269_v51 }
 0x115   : > { %v528_v50 = vpop.f32.mrf.mxu0  ;;  %v601_v52 = vpop.f32.mrf.mxu1  ;;  %v708_v53 = vmul.f32 %v676_v41, %v628_v37  ;;  %v710_v54 = vmul.f32 %v676_v41, %v630_v38  ;;  %v736_v58 = vadd.f32 %v735_v46, %v705_v35  ;;  %v762_v59 = vadd.f32 %v761_v47, %v707_v36 }
 0x116   : > { %v632_v55 = vmax.f32 %v527_v44, 0.0  ;;  %v634_v57 = vmax.f32 %v600_v45, 0.0  ;;  %v529_v60 = vadd.f32 %v528_v50, %v1269_v51  ;;  %v602_v61 = vadd.f32 %v601_v52, %v1269_v51 }
 0x117   : > { %v530_v62 = vpop.f32.mrf.mxu0  ;;  %v603_v63 = vpop.f32.mrf.mxu1  ;;  %v709_v0 = vmul.f32 %v676_v41, %v629_v42  ;;  %v711_v2 = vmul.f32 %v676_v41, %v631_v43  ;;  %v724_v56 = vadd.f32 %v723_v48, %v708_v53  ;;  %v750_v11 = vadd.f32 %v749_v49, %v710_v54 }
 0x118   : > { %v712_v3 = vmul.f32 %v681_v21, %v632_v55  ;;  %v714_v4 = vmul.f32 %v681_v21, %v634_v57  ;;  %v633_v5 = vmax.f32 %v529_v60, 0.0  ;;  %v635_v6 = vmax.f32 %v602_v61, 0.0 }
 0x119   : > { %v531_v7 = vadd.f32 %v530_v62, %v347_v20  ;;  %v604_v8 = vadd.f32 %v603_v63, %v347_v20  ;;  %v532_v9 = vpop.f32.mrf.mxu0  ;;  %v605_v10 = vpop.f32.mrf.mxu1  ;;  %v737_v18 = vadd.f32 %v736_v58, %v709_v0  ;;  %v763_v19 = vadd.f32 %v762_v59, %v711_v2 }
 0x11a   : > { %v533_v12 = vadd.f32 %v532_v9, %v347_v20  ;;  %v606_v13 = vadd.f32 %v605_v10, %v347_v20  ;;  %v713_v14 = vmul.f32 %v681_v21, %v633_v5  ;;  %v715_v15 = vmul.f32 %v681_v21, %v635_v6 }
 0x11b   : > { %v636_v16 = vmax.f32 %v531_v7, 0.0  ;;  %v638_v51 = vmax.f32 %v604_v8, 0.0  ;;  %v725_v24 = vadd.f32 %v724_v56, %v712_v3  ;;  %v751_v25 = vadd.f32 %v750_v11, %v714_v4 }
 0x11c   : > { %v637_v22 = vmax.f32 %v533_v12, 0.0  ;;  %v639_v23 = vmax.f32 %v606_v13, 0.0  ;;  %v738_v28 = vadd.f32 %v737_v18, %v713_v14  ;;  %v764_v29 = vadd.f32 %v763_v19, %v715_v15 }
 0x11d   : > { %v716_v26 = vmul.f32 %v686_v17, %v636_v16  ;;  %v718_v27 = vmul.f32 %v686_v17, %v638_v51  ;;  %v1070_v44 = vmov 1966171168   ;;  %v787_v46 = vlaneseq }
 0x11e   : > { %v717_v30 = vmul.f32 %v686_v17, %v637_v22  ;;  %v719_v31 = vmul.f32 %v686_v17, %v639_v23  ;;  %v785_v45 = vunpack.c.l.s4 %v1070_v44  ;;  %v773_v61 = vstv %s772_s7 }
 0x11f   : > { %v726_v32 = vadd.f32 %v725_v24, %v716_v26  ;;  %v752_v33 = vadd.f32 %v751_v25, %v718_v27  ;;  %v788_v57 = vshrl.u32 %v787_v46, 7  ;;  %vm809_vm1 = vcmp.lt.s32.totalorder %v787_v46, 512 }
 0x120   : > { %v739_v20 = vadd.f32 %v738_v28, %v717_v30  ;;  %v765_v34 = vadd.f32 %v764_v29, %v719_v31  ;;  %v786_v55 = vunpack.c.0.s8 %v785_v45 }
 0x121   : > { %v727_v1 = vrot.slane %v726_v32, 4  ;;  %v753_v35 = vrot.slane %v752_v33, 4 }
 0x122   : > { %v740_v36 = vrot.slane %v739_v20, 4  ;;  %v766_v37 = vrot.slane %v765_v34, 4  ;;  %v789_v2 = vsub.s32 %v786_v55, %v788_v57 }
 0x123   : > { %v728_v38 = vadd.f32 %v727_v1, %v726_v32  ;;  %v754_v39 = vadd.f32 %v753_v35, %v752_v33 }
 0x124   : > { %v741_v40 = vadd.f32 %v740_v36, %v739_v20  ;;  %v767_v41 = vadd.f32 %v766_v37, %v765_v34 }
 0x125   : > { %v729_v42 = vrot.slane %v728_v38, 2  ;;  %v755_v43 = vrot.slane %v754_v39, 2 }
 0x126   : > { %v742_v47 = vrot.slane %v741_v40, 2  ;;  %v768_v48 = vrot.slane %v767_v41, 2 }
 0x127   : > { %v730_v49 = vadd.f32 %v729_v42, %v728_v38  ;;  %v756_v50 = vadd.f32 %v755_v43, %v754_v39 }
 0x128   : > { %v743_v52 = vadd.f32 %v742_v47, %v741_v40  ;;  %v769_v21 = vadd.f32 %v768_v48, %v767_v41 }
 0x129   : > { %v731_v53 = vrot.slane %v730_v49, 1  ;;  %v757_v54 = vrot.slane %v756_v50, 1 }
 0x12a   : > { %v744_v58 = vrot.slane %v743_v52, 1  ;;  %v770_v59 = vrot.slane %v769_v21, 1 }
 0x12b   : > { %v732_v60 = vadd.f32 %v731_v53, %v730_v49  ;;  %v758_v62 = vadd.f32 %v757_v54, %v756_v50 }
 0x12c   : > { %v745_v63 = vadd.f32 %v744_v58, %v743_v52  ;;  %v771_v0 = vadd.f32 %v770_v59, %v769_v21 }
 0x12d   : > { %v774_v3 = vadd.f32 %v773_v61, %v732_v60  ;;  %v776_v4 = vadd.f32 %v773_v61, %v758_v62 }
 0x12e   : > { %v775_v5 = vadd.f32 %v773_v61, %v745_v63  ;;  %v777_v6 = vadd.f32 %v773_v61, %v771_v0 }
 0x130   : > { %v782_v7 = vcombine.low %v774_v3, %v775_v5  ;;  %v783_v8 = vcombine.low %v776_v4, %v777_v6 }
 0x132   : > { %v790_v9 = vrot.slane %v782_v7, %v789_v2  ;;  %v797_v10 = vrot.slane %v783_v8, %v789_v2 }
 0x134   : > { %v798_v56 = vcombine.low %v790_v9, %v797_v10 }
 0x136   : > { %v805_v11 = vrot.slane %v798_v56, %v789_v2 }
 0x138   : > { %811 = vst.msk [vmem:[%s273_s10] sm:$0xf] %vm809_vm1, %v805_v11 }
 0x139   : > { %1020 = shalt.err (!%p1017_p5)
}
 0x13a   : > { %s1021_s24 = scalar_lea.hbm %s825_s15, 64  ;;  %s1025_s27 = scalar_lea.hbm %s1327_s5, 128 }
 0x13b   : > { %p1022_p7 = scmp.ne.s32.totalorder %s825_s15, %s1021_s24  ;;  %p1026_p12 = scmp.lt.s32.totalorder %s825_s15, %s1327_s5 }
 0x13c   : > { %p1027_p13 = scmp.lt.s32.totalorder %s1025_s27, %s1021_s24 }
 0x13d   : > { %p1023_p10 = pnand %p1022_p7, %p1143_p6 }
 0x13e   : > { %p1028_p0 = por %p1027_p13, %p1026_p12 }
 0x13f   : > { %p1024_p11 = pneg %p1023_p10 }
 0x141   : > { %p1029_p9 = pnand %p1028_p0, %p1024_p11 }
 0x143   : > { %1032 = shalt.err (!%p1029_p9)
}
 0x144   : > { %936 = dma.vmem_to_hbm [thread:$0]  (%p1143_p6), %s828_s11, 64, %s825_s15, %s813_s16  }
 0x145 PF: > { %s839_s8 = sand.u32 1, %s1055_s20   ;;  %p1331_p1 = scmp.ge.s32.totalorder %s1067_s23, 2 }
 0x146   : > { %s840_s9 = scalar_lea.sflag [#allocation5], %s839_s8 }
 0x147   : > { %p939_p2 = pnand %p1331_p1, %p1147_p8 }
 0x149   : > { %p940_p3 = pneg %p939_p2 }
 0x14b   : > { %1050 = dma.done.wait (%p940_p3), %s840_s9, 64  }
 0x14c   : > { %1052 = vsyncadd (%p940_p3), %s840_s9, 4294967232  ;;  %p16_p9 = scmp.ge.s32.totalorder %s1128_s25, 4   ;;  %s1332_s20 = smov %s1059_s21 }
 0x14d   : > { %s1333_s21 = smov %s1063_s22  ;;  %s1334_s22 = smov %s1141_s28 }
 0x14e   : > { %s1335_s23 = smov %s1128_s25  ;;  %18 = sbr.rel (!%p16_p9) target bundleno = 5 (0x5), region = 103 }
 0x153   :  { %845 = vsyncpa [#allocation5], 1 }
 0x154   :  { %847 = vsyncpa [#allocation5 + $0x1], 1 }

</bundles_post_ra>
